<compile_context>
chip_gen: v5e
topology: v5e:2x2
jax: 0.10.0
libtpu: 0.0.40
codegen_flags: <defaults>
</compile_context>

<pallas_src>
import math
from functools import partial

import jax
import jax.numpy as jnp
from jax import lax
from jax.experimental import pallas as pl
from jax.experimental.pallas import tpu as pltpu


# ---------------------------------------------------------------------------
# small helpers (wrapper-side layout plumbing only)
# ---------------------------------------------------------------------------
def _round_up(n, m):
    return ((n + m - 1) // m) * m


def _nchw_to_flat(x):
    """(B, C, H, W) -> (B*H*W, C), channels on the lane (fast) axis."""
    B, C, H, W = x.shape
    return jnp.transpose(x, (0, 2, 3, 1)).reshape(B * H * W, C)


def _flat_to_nchw(x, B, H, W):
    C = x.shape[-1]
    return jnp.transpose(x.reshape(B, H, W, C), (0, 3, 1, 2))


_PARALLEL_1D = pltpu.CompilerParams(dimension_semantics=("parallel",))


# ---------------------------------------------------------------------------
# Kernel 1: tiled GEMM + bias (+ fused residual)
# ---------------------------------------------------------------------------
def _mm_bias_kernel(x_ref, w_ref, b_ref, o_ref):
    acc = jnp.dot(x_ref[...], w_ref[...], preferred_element_type=jnp.float32)
    o_ref[...] = (acc + b_ref[...]).astype(o_ref.dtype)


def _mm_bias_res_kernel(x_ref, w_ref, b_ref, r_ref, o_ref):
    acc = jnp.dot(x_ref[...], w_ref[...], preferred_element_type=jnp.float32)
    o_ref[...] = (acc + b_ref[...] + r_ref[...].astype(jnp.float32)).astype(o_ref.dtype)


def matmul_bias(x, w, b, residual=None, tile_m=512):
    """out = x @ w + b (+ residual).  x:(M,K), w:(K,N), b:(N,), residual:(M,N)."""
    M, K = x.shape
    N = w.shape[1]
    # Tile the row axis (spatial*batch); K and N are small channel dims here and
    # stay whole.  tile_m=512 keeps double-buffered blocks well under the scoped
    # VMEM limit on all generations (including v7x's 64 MiB physical VMEM).
    tm = min(tile_m, _round_up(M, 8))
    Mp = _round_up(M, tm)
    if Mp != M:
        x = jnp.pad(x, ((0, Mp - M), (0, 0)))
        if residual is not None:
            residual = jnp.pad(residual, ((0, Mp - M), (0, 0)))
    b2 = b.reshape(1, N).astype(jnp.float32)

    x_spec = pl.BlockSpec((tm, K), lambda i: (i, 0))
    w_spec = pl.BlockSpec((K, N), lambda i: (0, 0))
    b_spec = pl.BlockSpec((1, N), lambda i: (0, 0))
    o_spec = pl.BlockSpec((tm, N), lambda i: (i, 0))
    grid = (Mp // tm,)

    if residual is None:
        out = pl.pallas_call(
            _mm_bias_kernel,
            out_shape=jax.ShapeDtypeStruct((Mp, N), jnp.float32),
            grid=grid,
            in_specs=[x_spec, w_spec, b_spec],
            out_specs=o_spec,
            compiler_params=_PARALLEL_1D,
        )(x.astype(jnp.float32), w.astype(jnp.float32), b2)
    else:
        r_spec = pl.BlockSpec((tm, N), lambda i: (i, 0))
        out = pl.pallas_call(
            _mm_bias_res_kernel,
            out_shape=jax.ShapeDtypeStruct((Mp, N), jnp.float32),
            grid=grid,
            in_specs=[x_spec, w_spec, b_spec, r_spec],
            out_specs=o_spec,
            compiler_params=_PARALLEL_1D,
        )(x.astype(jnp.float32), w.astype(jnp.float32), b2,
          residual.astype(jnp.float32))
    return out[:M]


# ---------------------------------------------------------------------------
# Kernel 2: GroupNorm (+ optional Swish), one (batch, group) block per grid step
# ---------------------------------------------------------------------------
def _gn_kernel(x_ref, w_ref, b_ref, o_ref, *, eps, swish):
    x = x_ref[...].astype(jnp.float32)          # (Cg, H*W)
    n = x.shape[0] * x.shape[1]
    mean = jnp.sum(x) * (1.0 / n)
    xc = x - mean
    var = jnp.sum(xc * xc) * (1.0 / n)
    y = xc * lax.rsqrt(var + eps)
    y = y * w_ref[...] + b_ref[...]             # per-channel affine, (Cg,1) broadcast
    if swish:
        y = y * (1.0 / (1.0 + jnp.exp(-y)))     # Swish, math kept in f32
    o_ref[...] = y.astype(o_ref.dtype)


def group_norm(x, weight, bias, num_groups, *, eps=1e-5, swish=False):
    B, C, H, W = x.shape
    G = num_groups
    Cg = C // G
    HW = H * W
    xr = x.reshape(B * G, Cg, HW).astype(jnp.float32)
    wr = weight.reshape(G, Cg, 1).astype(jnp.float32)
    br = bias.reshape(G, Cg, 1).astype(jnp.float32)
    # TODO(synk): for very large H*W a two-pass / Welford tiling over HW is needed;
    # one (Cg, HW) block per step is fine at typical diffusion feature-map sizes.
    out = pl.pallas_call(
        partial(_gn_kernel, eps=eps, swish=swish),
        out_shape=jax.ShapeDtypeStruct((B * G, Cg, HW), jnp.float32),
        grid=(B * G,),
        in_specs=[
            pl.BlockSpec((None, Cg, HW), lambda i: (i, 0, 0)),
            pl.BlockSpec((None, Cg, 1), lambda i: (i % G, 0, 0)),
            pl.BlockSpec((None, Cg, 1), lambda i: (i % G, 0, 0)),
        ],
        out_specs=pl.BlockSpec((None, Cg, HW), lambda i: (i, 0, 0)),
        compiler_params=_PARALLEL_1D,
    )(xr, wr, br)
    return out.reshape(B, C, H, W)


# ---------------------------------------------------------------------------
# Convolutions (im2col / channel flatten in the wrapper, GEMM on the MXU)
# ---------------------------------------------------------------------------
def conv2d_3x3(x, w, b, residual=None):
    """3x3 conv, stride 1, padding 1.  x:(B,Cin,H,W), w:(Cout,Cin,3,3), b:(Cout,)."""
    B, Cin, H, W = x.shape
    Cout = w.shape[0]
    xl = jnp.transpose(x, (0, 2, 3, 1))                     # (B, H, W, Cin)
    xp = jnp.pad(xl, ((0, 0), (1, 1), (1, 1), (0, 0)))
    patches = jnp.concatenate(
        [xp[:, dy:dy + H, dx:dx + W, :] for dy in range(3) for dx in range(3)],
        axis=-1,
    ).reshape(B * H * W, 9 * Cin)                           # im2col (layout plumbing)
    wm = jnp.transpose(w, (2, 3, 1, 0)).reshape(9 * Cin, Cout)
    res_flat = None if residual is None else _nchw_to_flat(residual)
    out = matmul_bias(patches, wm, b, residual=res_flat)
    return _flat_to_nchw(out, B, H, W)


def conv2d_1x1(x, w, b=None, residual=None):
    """1x1 conv.  x:(B,Cin,H,W), w:(Cout,Cin,1,1)."""
    B, Cin, H, W = x.shape
    Cout = w.shape[0]
    if b is None:
        b = jnp.zeros((Cout,), jnp.float32)
    wm = w.reshape(Cout, Cin).T
    res_flat = None if residual is None else _nchw_to_flat(residual)
    out = matmul_bias(_nchw_to_flat(x), wm, b, residual=res_flat)
    return _flat_to_nchw(out, B, H, W)


# ---------------------------------------------------------------------------
# Kernel 3: PositionalEncoding2D  (cos folded into sin via +pi/2 phase bias)
# ---------------------------------------------------------------------------
def _pe2d_kernel(sel_ref, yx_ref, o_ref):
    sel = sel_ref[...]                          # (Cp, 3): [freq, phase_bias, use_x]
    freq = sel[:, 0:1]
    bias = sel[:, 1:2]
    use_x = sel[:, 2:3]
    y = yx_ref[0:1, :]                          # (1, TILE)
    x = yx_ref[1:2, :]
    pos = y + use_x * (x - y)                   # arithmetic blend, no select
    o_ref[...] = jnp.sin(pos * freq + bias).astype(o_ref.dtype)


def positional_encoding_2d(B, H, W, org_channels, *, dtype=jnp.float32, tile_n=2048):
    channels = int(math.ceil(org_channels / 4) * 2)
    inv_freq = 1.0 / (10000.0 ** (jnp.arange(0, channels, 2, dtype=jnp.float32) / channels))

    # Per-output-channel selectors (sin/cos interleave + y/x concat + truncation
    # folded into freq / phase-bias / axis-select rows).
    C = org_channels
    Cp = _round_up(C, 8)                        # sublane-dense rows
    c_idx = jnp.arange(Cp)
    in_range = c_idx < C
    use_x = (c_idx >= channels) & in_range
    local = jnp.where(use_x, c_idx - channels, c_idx)
    freq_row = jnp.where(in_range,
                         inv_freq[jnp.clip(local // 2, 0, channels // 2 - 1)], 0.0)
    bias_row = jnp.where(in_range, (local % 2).astype(jnp.float32) * (math.pi / 2), 0.0)
    sel = jnp.stack([freq_row.astype(jnp.float32), bias_row,
                     use_x.astype(jnp.float32)], axis=1)        # (Cp, 3)

    # Lane-dense position tiles (padded to a multiple of 128, sliced afterwards).
    N = H * W
    tn = min(tile_n, _round_up(N, 128))
    Np = _round_up(N, tn)
    i = jnp.arange(Np)
    yx = jnp.stack([(i // W).astype(jnp.float32),
                    (i % W).astype(jnp.float32)], axis=0)       # (2, Np)

    out = pl.pallas_call(
        _pe2d_kernel,
        out_shape=jax.ShapeDtypeStruct((Cp, Np), jnp.float32),
        grid=(Np // tn,),
        in_specs=[
            pl.BlockSpec((Cp, 3), lambda t: (0, 0)),
            pl.BlockSpec((2, tn), lambda t: (0, t)),
        ],
        out_specs=pl.BlockSpec((Cp, tn), lambda t: (0, t)),
        compiler_params=_PARALLEL_1D,
    )(sel, yx)

    pe = out[:C, :N].reshape(C, H, W)
    return jnp.broadcast_to(pe[None], (B, C, H, W)).astype(dtype)


# ---------------------------------------------------------------------------
# Kernel 4: per-(batch, head) softmax attention
# ---------------------------------------------------------------------------
def _attn_kernel(q_ref, k_ref, v_ref, o_ref, *, scale):
    q = q_ref[...].astype(jnp.float32)          # (S, hd)
    k = k_ref[...].astype(jnp.float32)
    v = v_ref[...].astype(jnp.float32)
    s = jnp.dot(q, k.T, preferred_element_type=jnp.float32) * scale    # (S, S)
    s = s - jnp.max(s, axis=-1, keepdims=True)
    e = jnp.exp(s)
    p = e * pl.reciprocal(jnp.sum(e, axis=-1, keepdims=True), approx=False)
    o_ref[...] = jnp.dot(p, v, preferred_element_type=jnp.float32).astype(o_ref.dtype)


def attention_core(q, k, v, scale):
    """q, k, v: (B*n_head, S, head_dim) -> (B*n_head, S, head_dim)."""
    BN, S, hd = q.shape
    spec = pl.BlockSpec((None, S, hd), lambda i: (i, 0, 0))
    # TODO(synk): mask support and flash-style S tiling for long sequences.
    return pl.pallas_call(
        partial(_attn_kernel, scale=scale),
        out_shape=jax.ShapeDtypeStruct((BN, S, hd), jnp.float32),
        grid=(BN,),
        in_specs=[spec, spec, spec],
        out_specs=spec,
        compiler_params=_PARALLEL_1D,
    )(q.astype(jnp.float32), k.astype(jnp.float32), v.astype(jnp.float32))


# ---------------------------------------------------------------------------
# Module-level wrappers
# ---------------------------------------------------------------------------
def resnet_block_forward(x, p, *, norm_groups):
    dim = x.shape[1]
    dim_out = p['conv1_w'].shape[0]
    h = group_norm(x, p['gn1_w'], p['gn1_b'], norm_groups, swish=True)
    h = conv2d_3x3(h, p['conv1_w'], p['conv1_b'])
    h = group_norm(h, p['gn2_w'], p['gn2_b'], norm_groups, swish=True)
    # dropout == 0 -> Identity
    res = conv2d_1x1(x, p['res_w'], p['res_b']) if dim != dim_out else x
    return conv2d_3x3(h, p['conv2_w'], p['conv2_b'], residual=res)   # fused `+ res_conv(x)`


def self_attention_2d(x, p, *, norm_groups, n_head=1):
    B, C, H, W = x.shape
    hd = C // n_head
    S = H * W
    xn = group_norm(x, p['attn_gn_w'], p['attn_gn_b'], norm_groups, swish=False)
    qkv = conv2d_1x1(xn, p['qkv_w'], None)                       # bias=False
    qkv = _nchw_to_flat(qkv).reshape(B, S, n_head, 3, hd)

    def heads(t):                                                # (B,S,nh,hd) -> (B*nh,S,hd)
        return jnp.transpose(t, (0, 2, 1, 3)).reshape(B * n_head, S, hd)

    q, k, v = (heads(qkv[:, :, :, j, :]) for j in range(3))
    o = attention_core(q, k, v, scale=1.0 / math.sqrt(C))
    o_flat = jnp.transpose(o.reshape(B, n_head, S, hd), (0, 2, 1, 3)).reshape(B * S, C)
    out = matmul_bias(o_flat, p['out_w'].reshape(C, C).T, p['out_b'],
                      residual=_nchw_to_flat(x))                 # fused `+ input`
    return _flat_to_nchw(out, B, H, W)


def resnet_bloc_with_attn_forward(x, p, *, norm_groups, with_attn, n_head=1):
    h = resnet_block_forward(x, p, norm_groups=norm_groups)
    if not with_attn:
        return h
    B, C, H, W = h.shape
    # Faithful to the original module: the positional encoding REPLACES the
    # resblock output (x = self.pe(...)), it is not added to it.
    pe = positional_encoding_2d(B, H, W, C, dtype=h.dtype)
    return self_attention_2d(pe, p, norm_groups=norm_groups, n_head=n_head)


# ---------------------------------------------------------------------------
# Pure-JAX reference (transcription of the PyTorch module) for verification
# ---------------------------------------------------------------------------
_HI = lax.Precision.HIGHEST


def _conv_ref(x, w, b, pad):
    out = lax.conv_general_dilated(x, w, (1, 1), ((pad, pad), (pad, pad)),
                                   dimension_numbers=('NCHW', 'OIHW', 'NCHW'),
                                   precision=_HI)
    return out if b is None else out + b.reshape(1, -1, 1, 1)


def _gn_ref(x, w, b, G, eps=1e-5):
    B, C, H, W = x.shape
    xg = x.reshape(B, G, -1)
    mean = jnp.mean(xg, axis=-1, keepdims=True)
    var = jnp.mean((xg - mean) ** 2, axis=-1, keepdims=True)
    xn = ((xg - mean) / jnp.sqrt(var + eps)).reshape(B, C, H, W)
    return xn * w.reshape(1, C, 1, 1) + b.reshape(1, C, 1, 1)


def _pe2d_ref(B, H, W, orig_ch):
    channels = int(math.ceil(orig_ch / 4) * 2)
    inv_freq = 1.0 / (10000.0 ** (jnp.arange(0, channels, 2, dtype=jnp.float32) / channels))
    sin_y = jnp.einsum('i,j->ij', jnp.arange(H, dtype=jnp.float32), inv_freq)
    sin_x = jnp.einsum('i,j->ij', jnp.arange(W, dtype=jnp.float32), inv_freq)

    def get_emb(s):
        return jnp.stack((jnp.sin(s), jnp.cos(s)), axis=-1).reshape(s.shape[0], -1)

    emb = jnp.zeros((H, W, 2 * channels), dtype=jnp.float32)
    emb = emb.at[:, :, :channels].set(jnp.broadcast_to(get_emb(sin_y)[:, None, :],
                                                       (H, W, channels)))
    emb = emb.at[:, :, channels:2 * channels].set(jnp.broadcast_to(get_emb(sin_x)[None, :, :],
                                                                   (H, W, channels)))
    pe = jnp.broadcast_to(emb[None, :, :, :orig_ch], (B, H, W, orig_ch))
    return jnp.transpose(pe, (0, 3, 1, 2))


def _attn_ref(x, p, G, n_head=1):
    B, C, H, W = x.shape
    hd = C // n_head
    n = _gn_ref(x, p['attn_gn_w'], p['attn_gn_b'], G)
    qkv = _conv_ref(n, p['qkv_w'], None, 0).reshape(B, n_head, hd * 3, H, W)
    q, k, v = jnp.split(qkv, 3, axis=2)
    attn = jnp.einsum('bnchw,bncyx->bnhwyx', q, k, precision=_HI) / math.sqrt(C)
    attn = jax.nn.softmax(attn.reshape(B, n_head, H, W, H * W), axis=-1)
    attn = attn.reshape(B, n_head, H, W, H, W)
    out = jnp.einsum('bnhwyx,bncyx->bnchw', attn, v, precision=_HI).reshape(B, C, H, W)
    return _conv_ref(out, p['out_w'], p['out_b'], 0) + x


def _forward_ref(x, p, *, norm_groups, with_attn, n_head=1):
    sw = lambda t: t * jax.nn.sigmoid(t)
    h = sw(_gn_ref(x, p['gn1_w'], p['gn1_b'], norm_groups))
    h = _conv_ref(h, p['conv1_w'], p['conv1_b'], 1)
    h = sw(_gn_ref(h, p['gn2_w'], p['gn2_b'], norm_groups))
    h = _conv_ref(h, p['conv2_w'], p['conv2_b'], 1)
    res = _conv_ref(x, p['res_w'], p['res_b'], 0) if x.shape[1] != p['conv1_w'].shape[0] else x
    h = h + res
    if not with_attn:
        return h
    B, C, H, W = h.shape
    return _attn_ref(_pe2d_ref(B, H, W, C), p, norm_groups, n_head)


# ---------------------------------------------------------------------------
if __name__ == "__main__":
    key = jax.random.PRNGKey(0)
    B, dim, dim_out = 2, 8, 16
    H = W = 8
    norm_groups = 4
    n_head = 1

    ks = jax.random.split(key, 16)
    nrm = lambda k, s, sc=0.2: jax.random.normal(k, s, dtype=jnp.float32) * sc

    params = {
        'gn1_w': 1.0 + nrm(ks[0], (dim,), 0.1),          'gn1_b': nrm(ks[1], (dim,), 0.1),
        'conv1_w': nrm(ks[2], (dim_out, dim, 3, 3)),     'conv1_b': nrm(ks[3], (dim_out,), 0.1),
        'gn2_w': 1.0 + nrm(ks[4], (dim_out,), 0.1),      'gn2_b': nrm(ks[5], (dim_out,), 0.1),
        'conv2_w': nrm(ks[6], (dim_out, dim_out, 3, 3)), 'conv2_b': nrm(ks[7], (dim_out,), 0.1),
        'res_w': nrm(ks[8], (dim_out, dim, 1, 1)),       'res_b': nrm(ks[9], (dim_out,), 0.1),
        'attn_gn_w': 1.0 + nrm(ks[10], (dim_out,), 0.1), 'attn_gn_b': nrm(ks[11], (dim_out,), 0.1),
        'qkv_w': nrm(ks[12], (3 * dim_out, dim_out, 1, 1)),
        'out_w': nrm(ks[13], (dim_out, dim_out, 1, 1)),  'out_b': nrm(ks[14], (dim_out,), 0.1),
    }
    x = jax.random.normal(ks[15], (B, dim, H, W), dtype=jnp.float32)

    out_attn = jax.block_until_ready(
        resnet_bloc_with_attn_forward(x, params, norm_groups=norm_groups,
                                      with_attn=True, n_head=n_head))
    out_plain = jax.block_until_ready(
        resnet_bloc_with_attn_forward(x, params, norm_groups=norm_groups,
                                      with_attn=False, n_head=n_head))

    ref_attn = _forward_ref(x, params, norm_groups=norm_groups, with_attn=True, n_head=n_head)
    ref_plain = _forward_ref(x, params, norm_groups=norm_groups, with_attn=False, n_head=n_head)

    assert out_attn.shape == (B, dim_out, H, W), out_attn.shape
    assert out_plain.shape == (B, dim_out, H, W), out_plain.shape
    assert jnp.allclose(out_attn, ref_attn, atol=5e-2, rtol=5e-2), (
        "attn path mismatch, max|diff|=%e" % float(jnp.max(jnp.abs(out_attn - ref_attn))))
    assert jnp.allclose(out_plain, ref_plain, atol=5e-2, rtol=5e-2), (
        "resblock path mismatch, max|diff|=%e" % float(jnp.max(jnp.abs(out_plain - ref_plain))))

    print("KERNEL_OK")
</pallas_src>

<mosaic_0001>
module attributes {stable_mosaic.version = 11 : i64} {
  func.func @_gn_kernel(%arg0: i32, %arg1: memref<1x2x64xf32, #tpu.memory_space<vmem>>, %arg2: memref<1x2x1xf32, #tpu.memory_space<vmem>>, %arg3: memref<1x2x1xf32, #tpu.memory_space<vmem>>, %arg4: memref<1x2x64xf32, #tpu.memory_space<vmem>>) attributes {dimension_semantics = [#tpu.dimension_semantics<parallel>], iteration_bounds = array<i64: 8>, scalar_prefetch = 0 : i64, scratch_operands = 0 : i64, tpu.core_type = #tpu.core_type<tc>, window_params = [{transform_indices = @transform_0, window_bounds = array<i64: 1, 2, 64>}, {transform_indices = @transform_1, window_bounds = array<i64: 1, 2, 1>}, {transform_indices = @transform_2, window_bounds = array<i64: 1, 2, 1>}, {transform_indices = @transform_3, window_bounds = array<i64: 1, 2, 64>}]} {
    %c0 = arith.constant 0 : index
    %c0_0 = arith.constant 0 : index
    %c0_1 = arith.constant 0 : index
    %0 = vector.load %arg1[%c0, %c0_0, %c0_1] : memref<1x2x64xf32, #tpu.memory_space<vmem>>, vector<1x2x64xf32>
    %1 = vector.shape_cast %0 : vector<1x2x64xf32> to vector<2x64xf32>
    %2 = vector.shape_cast %1 : vector<2x64xf32> to vector<1x2x64xf32>
    %cst = arith.constant dense<0.000000e+00> : vector<1xf32>
    %3 = vector.multi_reduction <add>, %2, %cst [1, 2] : vector<1x2x64xf32> to vector<1xf32>
    %4 = vector.shape_cast %3 : vector<1xf32> to vector<1x1x1xf32>
    %5 = vector.extract %4[0, 0, 0] : f32 from vector<1x1x1xf32>
    %cst_2 = arith.constant 7.812500e-03 : f32
    %6 = arith.mulf %5, %cst_2 : f32
    %7 = vector.broadcast %6 : f32 to vector<2x64xf32>
    %8 = arith.subf %1, %7 : vector<2x64xf32>
    %9 = arith.mulf %8, %8 : vector<2x64xf32>
    %10 = vector.shape_cast %9 : vector<2x64xf32> to vector<1x2x64xf32>
    %cst_3 = arith.constant dense<0.000000e+00> : vector<1xf32>
    %11 = vector.multi_reduction <add>, %10, %cst_3 [1, 2] : vector<1x2x64xf32> to vector<1xf32>
    %12 = vector.shape_cast %11 : vector<1xf32> to vector<1x1x1xf32>
    %13 = vector.extract %12[0, 0, 0] : f32 from vector<1x1x1xf32>
    %cst_4 = arith.constant 7.812500e-03 : f32
    %14 = arith.mulf %13, %cst_4 : f32
    %cst_5 = arith.constant 9.99999974E-6 : f32
    %15 = arith.addf %14, %cst_5 : f32
    %16 = math.rsqrt %15 : f32
    %17 = vector.broadcast %16 : f32 to vector<2x64xf32>
    %18 = arith.mulf %8, %17 : vector<2x64xf32>
    %c0_6 = arith.constant 0 : index
    %c0_7 = arith.constant 0 : index
    %c0_8 = arith.constant 0 : index
    %19 = vector.load %arg2[%c0_6, %c0_7, %c0_8] : memref<1x2x1xf32, #tpu.memory_space<vmem>>, vector<1x2x1xf32>
    %20 = vector.shape_cast %19 : vector<1x2x1xf32> to vector<2x1xf32>
    %21 = vector.broadcast %20 : vector<2x1xf32> to vector<2x64xf32>
    %22 = arith.mulf %18, %21 : vector<2x64xf32>
    %c0_9 = arith.constant 0 : index
    %c0_10 = arith.constant 0 : index
    %c0_11 = arith.constant 0 : index
    %23 = vector.load %arg3[%c0_9, %c0_10, %c0_11] : memref<1x2x1xf32, #tpu.memory_space<vmem>>, vector<1x2x1xf32>
    %24 = vector.shape_cast %23 : vector<1x2x1xf32> to vector<2x1xf32>
    %25 = vector.broadcast %24 : vector<2x1xf32> to vector<2x64xf32>
    %26 = arith.addf %22, %25 : vector<2x64xf32>
    %cst_12 = arith.constant 0.000000e+00 : f32
    %27 = vector.broadcast %cst_12 : f32 to vector<2x64xf32>
    %28 = arith.subf %27, %26 : vector<2x64xf32>
    %29 = math.exp %28 : vector<2x64xf32>
    %cst_13 = arith.constant 1.000000e+00 : f32
    %30 = vector.broadcast %cst_13 : f32 to vector<2x64xf32>
    %31 = arith.addf %30, %29 : vector<2x64xf32>
    %cst_14 = arith.constant 1.000000e+00 : f32
    %32 = vector.broadcast %cst_14 : f32 to vector<2x64xf32>
    %33 = arith.divf %32, %31 : vector<2x64xf32>
    %34 = arith.mulf %26, %33 : vector<2x64xf32>
    %c0_15 = arith.constant 0 : index
    %c0_16 = arith.constant 0 : index
    %c0_17 = arith.constant 0 : index
    %35 = vector.load %arg4[%c0_15, %c0_16, %c0_17] : memref<1x2x64xf32, #tpu.memory_space<vmem>>, vector<1x2x64xf32>
    %36 = vector.shape_cast %35 : vector<1x2x64xf32> to vector<2x64xf32>
    %37 = vector.shape_cast %34 : vector<2x64xf32> to vector<1x2x64xf32>
    tpu.vector_store %arg4[%c0_15, %c0_16, %c0_17], %37 {strides = array<i32>} : memref<1x2x64xf32, #tpu.memory_space<vmem>>, vector<1x2x64xf32>,
    return
  }
  func.func @transform_0(%arg0: i32) -> (i32, i32, i32) {
    %c0_i32 = arith.constant 0 : i32
    %c0_i32_0 = arith.constant 0 : i32
    %c0_i32_1 = arith.constant 0 : i32
    return %arg0, %c0_i32, %c0_i32_0 : i32, i32, i32
  }
  func.func @transform_1(%arg0: i32) -> (i32, i32, i32) {
    %c4_i32 = arith.constant 4 : i32
    %c0_i32 = arith.constant 0 : i32
    %0 = arith.cmpi eq, %c4_i32, %c0_i32 : i32
    %c1_i32 = arith.constant 1 : i32
    %1 = arith.select %0, %c1_i32, %c4_i32 : i32
    %2 = arith.remsi %arg0, %1 : i32
    %c0_i32_0 = arith.constant 0 : i32
    %3 = arith.cmpi ne, %2, %c0_i32_0 : i32
    %c0_i32_1 = arith.constant 0 : i32
    %4 = arith.cmpi slt, %2, %c0_i32_1 : i32
    %c0_i32_2 = arith.constant 0 : i32
    %5 = arith.cmpi slt, %1, %c0_i32_2 : i32
    %6 = arith.xori %4, %5 : i1
    %7 = arith.andi %6, %3 : i1
    %8 = arith.addi %2, %1 : i32
    %9 = arith.select %7, %8, %2 : i32
    %c0_i32_3 = arith.constant 0 : i32
    %c0_i32_4 = arith.constant 0 : i32
    %c0_i32_5 = arith.constant 0 : i32
    return %9, %c0_i32_3, %c0_i32_4 : i32, i32, i32
  }
  func.func @transform_2(%arg0: i32) -> (i32, i32, i32) {
    %c4_i32 = arith.constant 4 : i32
    %c0_i32 = arith.constant 0 : i32
    %0 = arith.cmpi eq, %c4_i32, %c0_i32 : i32
    %c1_i32 = arith.constant 1 : i32
    %1 = arith.select %0, %c1_i32, %c4_i32 : i32
    %2 = arith.remsi %arg0, %1 : i32
    %c0_i32_0 = arith.constant 0 : i32
    %3 = arith.cmpi ne, %2, %c0_i32_0 : i32
    %c0_i32_1 = arith.constant 0 : i32
    %4 = arith.cmpi slt, %2, %c0_i32_1 : i32
    %c0_i32_2 = arith.constant 0 : i32
    %5 = arith.cmpi slt, %1, %c0_i32_2 : i32
    %6 = arith.xori %4, %5 : i1
    %7 = arith.andi %6, %3 : i1
    %8 = arith.addi %2, %1 : i32
    %9 = arith.select %7, %8, %2 : i32
    %c0_i32_3 = arith.constant 0 : i32
    %c0_i32_4 = arith.constant 0 : i32
    %c0_i32_5 = arith.constant 0 : i32
    return %9, %c0_i32_3, %c0_i32_4 : i32, i32, i32
  }
  func.func @transform_3(%arg0: i32) -> (i32, i32, i32) {
    %c0_i32 = arith.constant 0 : i32
    %c0_i32_0 = arith.constant 0 : i32
    %c0_i32_1 = arith.constant 0 : i32
    return %arg0, %c0_i32, %c0_i32_0 : i32, i32, i32
  }
}

</mosaic_0001>

<bundles_post_ra>
// kernel: tpu_custom_call.1
= control target key start
LH: loop header
LB: loop body
LE: loop exit
PB: predicated region body
PF: predicated region fallthrough
CT: control target
= control target key end

     0   :  { %8 = vsyncpa [#allocation3], 0  ;;  %s810_s0 = inlined_call_operand.vmem [shape: f32[8,2,64], index: 0, kind: input, shape index: {}]   ;;  %s811_s1 = inlined_call_operand.vmem [shape: f32[4,2,1], index: 1, kind: input, shape index: {}]   ;;  %s812_s2 = inlined_call_operand.vmem [shape: f32[4,2,1], index: 2, kind: input, shape index: {}]   ;;  %s813_s3 = inlined_call_operand.hbm [shape: f32[8,2,64], index: 3, kind: output, shape index: {}]  }
   0x1   :  { %10 = vsyncpa [#allocation3 + $0x1], 0  ;;  %s713_s12 = smov 0   ;;  %s715_s13 = smov 0  }
   0x2   :  { %s717_s14 = smov 0   ;;  %s719_s15 = smov 0  }
   0x3 LB: > { %s734_s16 = sadd.s32 4294967295, %s690_s15   ;;  %s544_s17 = sadd.s32 4294967294, %s690_s15   ;;  %s690_s15 = sphi %s719_s15, %s819_s15   ;;  %s686_s14 = sphi %s717_s14, %s818_s14   ;;  %s682_s13 = sphi %s715_s13, %s817_s13   ;;  %s678_s12 = sphi %s713_s12, %s816_s12  }
   0x4   : > { %s738_s18 = sadd.s32 1, %s690_s15   ;;  %s149_s19 = sadd.s32 1, %s686_s14 }
   0x5   : > { %s146_s20 = ssub.s32 %s690_s15, %s738_s18  ;;  %p159_p0 = scmp.ne.s32.totalorder %s686_s14, %s682_s13 }
   0x6   : > { %p147_p1 = scmp.eq.s32.totalorder %s146_s20, 0  ;;  %p160_p2 = scmp.eq.s32.totalorder %s734_s16, 7 }
   0x7   : > { %p165_p3 = scmp.ne.s32.totalorder %s682_s13, %s678_s12  ;;  %p166_p4 = scmp.eq.s32.totalorder %s544_s17, 7 }
   0x8   : > { %s749_s21 = scalar_select %p147_p1, %s686_s14, %s149_s19  }
   0x9   : > { %p751_p5 = por %p160_p2, %p159_p0  ;;  %p755_p6 = por %p166_p4, %p165_p3 }
   0xa   : > { %p559_p7 = scmp.ge.s32.totalorder %s690_s15, 1  ;;  %p253_p8 = scmp.lt.s32.totalorder %s690_s15, 9 }
   0xc   : > { %p254_p9 = pnand %p559_p7, %p253_p8 }
   0xd   : > { %p308_p10 = scmp.lt.s32.totalorder (!%p254_p9), %s734_s16, 7  ;;  %s313_s4 = ssub.s32 (!%p254_p9), 0, %s734_s16 }
   0xe   : > { %257 = sbr.rel (%p254_p9) target bundleno = 504 (0x1f8), region = 32  ;;  %s562_s5 = smin.u32 (!%p254_p9), %s734_s16, %s313_s4 }
   0xf   : > { %s315_s6 = sand.u32 (!%p254_p9), 3, %s562_s5   ;;  %p312_p11 = scmp.lt.s32.totalorder (!%p254_p9), %s734_s16, 0 }
  0x10   : > { %s316_s7 = ssub.s32 (!%p254_p9), 0, %s315_s6  ;;  %s571_s4 = sshll.u32 (!%p254_p9), %s734_s16, 1 }
  0x13   : > { %s309_s24 = scalar_select %p308_p10, %s734_s16, 7  ;;  %vm369_vm0 = vcmask 517120   ;;  %v692_v14 = vmov 0  }
  0x14   : > { %s821_s7 = smov (!%p312_p11, %s316_s7), %s315_s6  ;;  %620 = vset.pattern.permute.xlu1 %v692_v14  ;;  %621 = vset.pattern.permute.xlu0 %v692_v14 }
  0x15   : > { %s561_s25 = sshll.u32 %s309_s24, 1  ;;  %p564_p12 = scmp.lt.s32.totalorder %s821_s7, 0 }
  0x16   : > { %s311_s28 = scalar_lea.vmem %s810_s0, %s561_s25  ;;  %s322_s8 = sadd.s32 4, %s821_s7 }
  0x17   : > { %v368_v0 = vld [vmem:[%s311_s28] sm:$0x3]  ;;  %s823_s8 = smov (!%p564_p12, %s322_s8), %s821_s7  ;;  %s456_s7 = scalar_lea.hbm %s813_s3, %s571_s4 }
  0x18   : > { %v370_v1 = vsel %vm369_vm0, %v368_v0, 0.0  ;;  %p324_p13 = scmp.lt.s32.totalorder %s823_s8, 3  ;;  %s460_s10 = sshll.u32 %s456_s7, 4  ;;  %s461_s10 = int_to_ptr.hbm [resolvable:$true] %s460_s10 }
  0x19   : > { %371 = vadd.xlane.f32.xlu0 %v370_v1  ;;  %s642_s11 = sshra.s32 %s461_s10, 4  ;;  %s643_s11 = int_to_ptr.hbm [resolvable:$true] %s642_s11 }
  0x1a   : > { %s825_s8 = smov (!%p324_p13, %s823_s8), 3  ;;  %p649_p3 = scmp.lt.s32.totalorder %s643_s11, %s813_s3 }
  0x1b   : > { %s565_s9 = sshll.u32 %s825_s8, 1 }
  0x1c   : > { %s327_s17 = scalar_lea.vmem %s811_s1, %s565_s9  ;;  %s355_s24 = scalar_lea.vmem %s812_s2, %s565_s9 }
  0x1d   : > { %v410_v13 = vld [vmem:[%s327_s17] sm:$0x3]  ;;  %s644_s17 = scalar_lea.hbm %s643_s11, 2 }
  0x1e   : > { %413 = vperm.xlu1 %620, %v410_v13   ;;  %v417_v15 = vld [vmem:[%s355_s24] sm:$0x3]  ;;  %p645_p0 = scmp.ne.s32.totalorder %s643_s11, %s644_s17  ;;  %s648_s24 = scalar_lea.hbm %s813_s3, 16 }
  0x1f   : > { %p650_p4 = scmp.lt.s32.totalorder %s648_s24, %s644_s17 }
  0x20   : > { %p646_p1 = pnand %p645_p0, %p751_p5 }
  0x21   : > { %p651_p7 = por %p650_p4, %p649_p3 }
  0x22   : > { %p647_p2 = pneg %p646_p1 }
  0x24   : > { %p652_p8 = pnand %p651_p7, %p647_p2 }
  0x26   : > { %420 = vperm.xlu1 %620, %v417_v15  }
  0x8c   : > { %v372_v2 = vpop.xlane.xlu0 %371 }
  0x8d   : > { %v373_v3 = vrot.slane %v372_v2, 4 }
  0x8f   : > { %v374_v4 = vadd.f32 %v373_v3, %v372_v2 }
  0x90   : > { %v414_v31 = vpop.permute.xlu1 %413 }
  0x91   : > { %v375_v5 = vrot.slane %v374_v4, 2 }
  0x93   : > { %v376_v6 = vadd.f32 %v375_v5, %v374_v4 }
  0x95   : > { %v377_v7 = vrot.slane %v376_v6, 1 }
  0x97   : > { %v378_v8 = vadd.f32 %v377_v7, %v376_v6 }
  0x98   : > { %v421_v35 = vpop.permute.xlu1 %420 }
  0x99   : > { %574 = vpush %v378_v8 }
  0xca   : > { %s575_s29 = spop %574 }
  0xcb   : > { %s380_s30 = smul.f32 0.0078125, %s575_s29  ;;  %s305_s29 = sand.u32 1, %s682_s13  }
  0xcc   : > { %s446_s16 = scalar_lea.sflag [#allocation3], %s305_s29 }
  0xcd   : > { %v381_v9 = vstv %s380_s30  ;;  %s560_s30 = sshll.u32 %s305_s29, 1 }
  0xce   : > { %v382_v10 = vsub.f32 %v368_v0, %v381_v9  ;;  %s307_s8 = scalar_lea.vmem [#allocation2], %s560_s30 }
  0xcf   : > { %s458_s9 = sshll.u32 %s307_s8, 4  ;;  %s459_s9 = int_to_ptr.vmem [resolvable:$true] %s458_s9 }
  0xd0   : > { %v383_v11 = vmul.f32 %v382_v10, %v382_v10 }
  0xd2   : > { %v384_v12 = vsel %vm369_vm0, %v383_v11, 0.0 }
  0xd3   : > { %385 = vadd.xlane.f32.xlu0 %v384_v12 }
 0x146   : > { %v386_v16 = vpop.xlane.xlu0 %385 }
 0x147   : > { %v387_v17 = vrot.slane %v386_v16, 4 }
 0x149   : > { %v388_v18 = vadd.f32 %v387_v17, %v386_v16 }
 0x14b   : > { %v389_v19 = vrot.slane %v388_v18, 2 }
 0x14d   : > { %v390_v20 = vadd.f32 %v389_v19, %v388_v18 }
 0x14f   : > { %v391_v21 = vrot.slane %v390_v20, 1 }
 0x151   : > { %v392_v22 = vadd.f32 %v391_v21, %v390_v20 }
 0x153   : > { %576 = vpush %v392_v22 }
 0x184   : > { %s577_s25 = spop %576 }
 0x185   : > { %s394_s26 = smul.f32 0.0078125, %s577_s25 }
 0x187   : > { %s395_s27 = sadd.f32 1e-05, %s394_s26 }
 0x189   : > { %v396_v23 = vstv %s395_s27 }
 0x18a   : > { %622 = vrsqrt.f32 %v396_v23  ;;  %vm403_vm2 = vweird.f32 %v396_v23 }
 0x190   : > { %v623_v24 = vpop.eup %622 }
 0x191   : > { %v398_v25 = vmul.f32 %v623_v24, %v396_v23  ;;  %vm404_vm1 = vweird.f32 %v623_v24 }
 0x192   : > { %vm405_vm3 = vmor %vm403_vm2, %vm404_vm1 }
 0x193   : > { %v399_v26 = vmul.f32 %v623_v24, %v398_v25 }
 0x195   : > { %v400_v27 = vmul.f32 0.5, %v399_v26 }
 0x197   : > { %v401_v28 = vsub.f32 1.5, %v400_v27 }
 0x199   : > { %v402_v29 = vmul.f32 %v623_v24, %v401_v28 }
 0x19b   : > { %v406_v30 = vsel %vm405_vm3, %v623_v24, %v402_v29 }
 0x19c   : > { %578 = vpush %v406_v30 }
 0x1cd   : > { %s579_s28 = spop %578 }
 0x1ce   : > { %v408_v32 = vstv %s579_s28 }
 0x1cf   : > { %v409_v33 = vmul.f32 %v408_v32, %v382_v10 }
 0x1d1   : > { %v416_v34 = vmul.f32 %v414_v31, %v409_v33 }
 0x1d3   : > { %v423_v36 = vadd.f32 %v421_v35, %v416_v34 }
 0x1d5   : > { %v424_v37 = vsub.f32 0.0, %v423_v36 }
 0x1d7   : > { %v425_v38 = vmul.f32 1.442695, %v424_v37 }
 0x1d9   : > { %624 = vpow2.f32 %v425_v38 }
 0x1df   : > { %v625_v39 = vpop.eup %624 }
 0x1e0   : > { %v427_v40 = vadd.f32 1.0, %v625_v39 }
 0x1e2   : > { %626 = vrcp.f32 %v427_v40  ;;  %v439_v44 = vand.u32 2147483648, %v427_v40  ;;  %v437_v46 = vand.u32 2147483647, %v427_v40  ;;  %vm433_vm5 = vweird.f32 %v427_v40 }
 0x1e4   : > { %v440_v48 = vor.u32 1.1754944e-38, %v439_v44  ;;  %vm438_vm7 = vcmp.eq.f32.partialorder %v437_v46, 8.507059e+37 }
 0x1e8   : > { %v627_v41 = vpop.eup %626 }
 0x1e9   : > { %v429_v42 = vmul.f32 %v627_v41, %v427_v40  ;;  %vm434_vm4 = vweird.f32 %v627_v41 }
 0x1ea   : > { %vm435_vm6 = vmor %vm433_vm5, %vm434_vm4 }
 0x1eb   : > { %v430_v43 = vsub.f32 1.0, %v429_v42 }
 0x1ed   : > { %v431_v45 = vmul.f32 %v627_v41, %v430_v43 }
 0x1ef   : > { %v432_v47 = vadd.f32 %v627_v41, %v431_v45 }
 0x1f1   : > { %v436_v49 = vsel %vm435_vm6, %v627_v41, %v432_v47 }
 0x1f2   : > { %v441_v50 = vsel %vm438_vm7, %v440_v48, %v436_v49 }
 0x1f3   : > { %v443_v51 = vmul.f32 %v441_v50, %v423_v36 }
 0x1f5   : > { %444 = vst.msk [vmem:[%s307_s8] sm:$0x3] %vm369_vm0, %v443_v51 }
 0x1f6   : > { %655 = shalt.err (!%p652_p8)
}
 0x1f7   : > { %580 = dma.vmem_to_hbm [thread:$0]  (%p751_p5), %s459_s9, 32, %s461_s10, %s446_s16  }
 0x1f8 PF: > { %p586_p9 = scmp.ge.s32.totalorder %s690_s15, 2  ;;  %s472_s27 = sand.u32 1, %s678_s12  }
 0x1f9   : > { %s473_s28 = scalar_lea.sflag [#allocation3], %s472_s27 }
 0x1fa   : > { %p583_p10 = pnand %p586_p9, %p755_p6 }
 0x1fc   : > { %p584_p11 = pneg %p583_p10 }
 0x1fe   : > { %673 = dma.done.wait (%p584_p11), %s473_s28, 32  }
 0x1ff   : > { %675 = vsyncadd (%p584_p11), %s473_s28, 4294967264  ;;  %p13_p12 = scmp.ge.s32.totalorder %s738_s18, 10   ;;  %s816_s12 = smov %s682_s13 }
 0x200   : > { %s817_s13 = smov %s686_s14  ;;  %s818_s14 = smov %s749_s21 }
 0x201   : > { %s819_s15 = smov %s738_s18  ;;  %15 = sbr.rel (!%p13_p12) target bundleno = 3 (0x3), region = 73 }
 0x206   :  { %479 = vsyncpa [#allocation3], 1 }
 0x207   :  { %481 = vsyncpa [#allocation3 + $0x1], 1 }

</bundles_post_ra>
